<compile_context>
chip_gen: v7x
topology: tpu7x:2x2x1
jax: 0.10.0
libtpu: 0.0.40
codegen_flags: <defaults>
</compile_context>

<pallas_src>
import jax
import jax.numpy as jnp
import numpy as np
from jax.experimental import pallas as pl
from jax.experimental.pallas import tpu as pltpu

_LANE = 128
_SUBLANE = 8          # f32 sublane count
_DEFAULT_TILE_B = 512  # batch tile; multiple of 8, VMEM-safe on all generations


def _round_up(x, m):
    return ((x + m - 1) // m) * m


def mlp_kernel(x_ref,
               w0_ref, b0_ref,
               w1_ref, b1_ref,
               w2_ref, b2_ref,
               w3_ref, b3_ref,
               w4_ref, b4_ref,
               o_ref):
    """Fused 5-layer MLP forward for one (TILE_B, feat) batch tile.

    Weights are bf16 and resident in VMEM across all grid steps; activations
    are cast to bf16 right before each MXU matmul, accumulation stays f32,
    bias add + ReLU happen in f32.
    """

    def layer(h, w_ref, b_ref, relu):
        acc = jnp.dot(h.astype(w_ref.dtype), w_ref[...],
                      preferred_element_type=jnp.float32) + b_ref[...]
        return jnp.maximum(acc, 0.0) if relu else acc

    h = x_ref[...]
    h = layer(h, w0_ref, b0_ref, True)
    h = layer(h, w1_ref, b1_ref, True)
    h = layer(h, w2_ref, b2_ref, True)
    h = layer(h, w3_ref, b3_ref, True)
    o_ref[...] = layer(h, w4_ref, b4_ref, False).astype(o_ref.dtype)


def _batch_spec(tile_b, feat):
    # x / out: tiled along batch, full (lane-dense) feature axis.
    return pl.BlockSpec((tile_b, feat), lambda i: (i, 0))


def _resident_spec(arr):
    # Weights / biases: full-array block with a constant index_map -> the tile
    # stays resident in VMEM across every grid step.  Using a helper function
    # (closure over a parameter, plus a default-arg capture) avoids the
    # late-binding-lambda bug of building specs inside a comprehension.
    ndim = arr.ndim
    return pl.BlockSpec(arr.shape, lambda i, _nd=ndim: (0,) * _nd)


def energy_naive_forward(x, params, tile_b=_DEFAULT_TILE_B):
    """x: (B, input_size) f32.  params: list of (W, b) with W (fan_in, fan_out) f32."""
    B, input_size = x.shape
    output_size = params[-1][0].shape[1]

    padded_in = _round_up(input_size, _LANE)
    padded_out = _round_up(output_size, _LANE)

    # Adapt the batch tile to small inputs; keep it a multiple of 8 (f32 sublane).
    tile_b = min(tile_b, _round_up(B, _SUBLANE))
    b_pad = _round_up(B, tile_b)

    # --- pad operands to lane-dense shapes (zero padding is exact) ----------
    x_p = jnp.pad(x.astype(jnp.float32),
                  ((0, b_pad - B), (0, padded_in - input_size)))

    (w0, b0), (w1, b1), (w2, b2), (w3, b3), (w4, b4) = params
    w0_p = jnp.pad(w0, ((0, padded_in - input_size), (0, 0)))
    w4_p = jnp.pad(w4, ((0, 0), (0, padded_out - output_size)))
    b4_p = jnp.pad(b4, ((0, 0), (0, padded_out - output_size)))

    # bf16 weights (MXU native), f32 biases (added after f32 accumulation).
    weights = [w0_p.astype(jnp.bfloat16), w1.astype(jnp.bfloat16),
               w2.astype(jnp.bfloat16), w3.astype(jnp.bfloat16),
               w4_p.astype(jnp.bfloat16)]
    biases = [b0.astype(jnp.float32), b1.astype(jnp.float32),
              b2.astype(jnp.float32), b3.astype(jnp.float32),
              b4_p.astype(jnp.float32)]

    flat_args = [x_p]
    in_specs = [_batch_spec(tile_b, padded_in)]
    for w, b in zip(weights, biases):
        flat_args += [w, b]
        in_specs += [_resident_spec(w), _resident_spec(b)]

    grid = (b_pad // tile_b,)

    layer_dims = [(padded_in, 256), (256, 256), (256, 128), (128, 128),
                  (128, padded_out)]
    flops = 2 * b_pad * sum(fi * fo for fi, fo in layer_dims)
    bytes_accessed = (x_p.size * 4 + b_pad * padded_out * 4
                      + sum(int(w.size) * 2 for w in weights)
                      + sum(int(b.size) * 4 for b in biases))

    out_p = pl.pallas_call(
        mlp_kernel,
        out_shape=jax.ShapeDtypeStruct((b_pad, padded_out), jnp.float32),
        grid=grid,
        in_specs=in_specs,
        out_specs=_batch_spec(tile_b, padded_out),
        compiler_params=pltpu.CompilerParams(
            dimension_semantics=("parallel",)),
        cost_estimate=pl.CostEstimate(flops=flops, transcendentals=0,
                                      bytes_accessed=bytes_accessed),
    )(*flat_args)

    return out_p[:B, :output_size]


def init_energy_naive_params(key, input_size, output_size):
    """Deterministic Kaiming-normal (fan_in, relu) init, zero bias — matches
    the PyTorch init_weights().  W stored as (fan_in, fan_out) == PyTorch W.T."""
    sizes = [(input_size, 256), (256, 256), (256, 128), (128, 128),
             (128, output_size)]
    params = []
    for fan_in, fan_out in sizes:
        key, sub = jax.random.split(key)
        std = np.sqrt(2.0 / fan_in)  # kaiming_normal_, mode='fan_in', relu gain
        w = (std * jax.random.normal(sub, (fan_in, fan_out))).astype(jnp.float32)
        b = jnp.zeros((1, fan_out), dtype=jnp.float32)
        params.append((w, b))
    return params


def reference_forward(x, params):
    """Pure-JAX reference emulating the kernel's numerics:
    bf16 weights/activations into the matmul, f32 accumulation + bias + ReLU."""
    h = x.astype(jnp.float32)
    for i, (w, b) in enumerate(params):
        h = jnp.dot(h.astype(jnp.bfloat16), w.astype(jnp.bfloat16),
                    preferred_element_type=jnp.float32) + b
        if i < len(params) - 1:
            h = jnp.maximum(h, 0.0)
    return h


if __name__ == "__main__":
    key = jax.random.PRNGKey(0)
    B, input_size, output_size = 8, 32, 16

    kp, kx = jax.random.split(key)
    params = init_energy_naive_params(kp, input_size, output_size)
    x = jax.random.normal(kx, (B, input_size), dtype=jnp.float32)

    out = energy_naive_forward(x, params)
    out = jax.block_until_ready(out)
    assert out.shape == (B, output_size)

    ref = reference_forward(x, params)
    np.testing.assert_allclose(np.asarray(out), np.asarray(ref),
                               rtol=1e-3, atol=1e-3)

    print("KERNEL_OK")
</pallas_src>

<mosaic_0001>
module attributes {stable_mosaic.version = 11 : i64} {
  func.func @mlp_kernel(%arg0: i32, %arg1: memref<8x128xf32, #tpu.memory_space<vmem>>, %arg2: memref<128x256xbf16, #tpu.memory_space<vmem>>, %arg3: memref<1x256xf32, #tpu.memory_space<vmem>>, %arg4: memref<256x256xbf16, #tpu.memory_space<vmem>>, %arg5: memref<1x256xf32, #tpu.memory_space<vmem>>, %arg6: memref<256x128xbf16, #tpu.memory_space<vmem>>, %arg7: memref<1x128xf32, #tpu.memory_space<vmem>>, %arg8: memref<128x128xbf16, #tpu.memory_space<vmem>>, %arg9: memref<1x128xf32, #tpu.memory_space<vmem>>, %arg10: memref<128x128xbf16, #tpu.memory_space<vmem>>, %arg11: memref<1x128xf32, #tpu.memory_space<vmem>>, %arg12: memref<8x128xf32, #tpu.memory_space<vmem>>) attributes {dimension_semantics = [#tpu.dimension_semantics<parallel>], iteration_bounds = array<i64: 1>, scalar_prefetch = 0 : i64, scratch_operands = 0 : i64, tpu.core_type = #tpu.core_type<tc>, window_params = [{transform_indices = @transform_0, window_bounds = array<i64: 8, 128>}, {pipeline_mode = #tpu.pipeline_mode<synchronous>, transform_indices = @transform_1, window_bounds = array<i64: 128, 256>}, {pipeline_mode = #tpu.pipeline_mode<synchronous>, transform_indices = @transform_2, window_bounds = array<i64: 1, 256>}, {pipeline_mode = #tpu.pipeline_mode<synchronous>, transform_indices = @transform_3, window_bounds = array<i64: 256, 256>}, {pipeline_mode = #tpu.pipeline_mode<synchronous>, transform_indices = @transform_4, window_bounds = array<i64: 1, 256>}, {pipeline_mode = #tpu.pipeline_mode<synchronous>, transform_indices = @transform_5, window_bounds = array<i64: 256, 128>}, {pipeline_mode = #tpu.pipeline_mode<synchronous>, transform_indices = @transform_6, window_bounds = array<i64: 1, 128>}, {pipeline_mode = #tpu.pipeline_mode<synchronous>, transform_indices = @transform_7, window_bounds = array<i64: 128, 128>}, {pipeline_mode = #tpu.pipeline_mode<synchronous>, transform_indices = @transform_8, window_bounds = array<i64: 1, 128>}, {pipeline_mode = #tpu.pipeline_mode<synchronous>, transform_indices = @transform_9, window_bounds = array<i64: 128, 128>}, {pipeline_mode = #tpu.pipeline_mode<synchronous>, transform_indices = @transform_10, window_bounds = array<i64: 1, 128>}, {transform_indices = @transform_11, window_bounds = array<i64: 8, 128>}]} {
    %c0 = arith.constant 0 : index
    %c0_0 = arith.constant 0 : index
    %0 = vector.load %arg1[%c0, %c0_0] : memref<8x128xf32, #tpu.memory_space<vmem>>, vector<8x128xf32>
    %1 = arith.truncf %0 : vector<8x128xf32> to vector<8x128xbf16>
    %c0_1 = arith.constant 0 : index
    %c0_2 = arith.constant 0 : index
    %2 = vector.load %arg2[%c0_1, %c0_2] : memref<128x256xbf16, #tpu.memory_space<vmem>>, vector<128x256xbf16>
    %cst = arith.constant dense<0.000000e+00> : vector<8x256xf32>
    %3 = tpu.matmul %1, %2, %cst {dimension_numbers = #tpu.dot_dimension_numbers<[1], [0], [0], [1], [0, 0, 1, 1], [], []>} : vector<8x128xbf16>, vector<128x256xbf16>, vector<8x256xf32> -> vector<8x256xf32>
    %c0_3 = arith.constant 0 : index
    %c0_4 = arith.constant 0 : index
    %4 = vector.load %arg3[%c0_3, %c0_4] : memref<1x256xf32, #tpu.memory_space<vmem>>, vector<1x256xf32>
    %5 = vector.broadcast %4 : vector<1x256xf32> to vector<8x256xf32>
    %6 = arith.addf %3, %5 : vector<8x256xf32>
    %cst_5 = arith.constant 0.000000e+00 : f32
    %7 = vector.broadcast %cst_5 : f32 to vector<8x256xf32>
    %8 = arith.maximumf %6, %7 : vector<8x256xf32>
    %9 = arith.truncf %8 : vector<8x256xf32> to vector<8x256xbf16>
    %c0_6 = arith.constant 0 : index
    %c0_7 = arith.constant 0 : index
    %10 = vector.load %arg4[%c0_6, %c0_7] : memref<256x256xbf16, #tpu.memory_space<vmem>>, vector<256x256xbf16>
    %cst_8 = arith.constant dense<0.000000e+00> : vector<8x256xf32>
    %11 = tpu.matmul %9, %10, %cst_8 {dimension_numbers = #tpu.dot_dimension_numbers<[1], [0], [0], [1], [0, 0, 1, 1], [], []>} : vector<8x256xbf16>, vector<256x256xbf16>, vector<8x256xf32> -> vector<8x256xf32>
    %c0_9 = arith.constant 0 : index
    %c0_10 = arith.constant 0 : index
    %12 = vector.load %arg5[%c0_9, %c0_10] : memref<1x256xf32, #tpu.memory_space<vmem>>, vector<1x256xf32>
    %13 = vector.broadcast %12 : vector<1x256xf32> to vector<8x256xf32>
    %14 = arith.addf %11, %13 : vector<8x256xf32>
    %cst_11 = arith.constant 0.000000e+00 : f32
    %15 = vector.broadcast %cst_11 : f32 to vector<8x256xf32>
    %16 = arith.maximumf %14, %15 : vector<8x256xf32>
    %17 = arith.truncf %16 : vector<8x256xf32> to vector<8x256xbf16>
    %c0_12 = arith.constant 0 : index
    %c0_13 = arith.constant 0 : index
    %18 = vector.load %arg6[%c0_12, %c0_13] : memref<256x128xbf16, #tpu.memory_space<vmem>>, vector<256x128xbf16>
    %cst_14 = arith.constant dense<0.000000e+00> : vector<8x128xf32>
    %19 = tpu.matmul %17, %18, %cst_14 {dimension_numbers = #tpu.dot_dimension_numbers<[1], [0], [0], [1], [0, 0, 1, 1], [], []>} : vector<8x256xbf16>, vector<256x128xbf16>, vector<8x128xf32> -> vector<8x128xf32>
    %c0_15 = arith.constant 0 : index
    %c0_16 = arith.constant 0 : index
    %20 = vector.load %arg7[%c0_15, %c0_16] : memref<1x128xf32, #tpu.memory_space<vmem>>, vector<1x128xf32>
    %21 = vector.broadcast %20 : vector<1x128xf32> to vector<8x128xf32>
    %22 = arith.addf %19, %21 : vector<8x128xf32>
    %cst_17 = arith.constant 0.000000e+00 : f32
    %23 = vector.broadcast %cst_17 : f32 to vector<8x128xf32>
    %24 = arith.maximumf %22, %23 : vector<8x128xf32>
    %25 = arith.truncf %24 : vector<8x128xf32> to vector<8x128xbf16>
    %c0_18 = arith.constant 0 : index
    %c0_19 = arith.constant 0 : index
    %26 = vector.load %arg8[%c0_18, %c0_19] : memref<128x128xbf16, #tpu.memory_space<vmem>>, vector<128x128xbf16>
    %cst_20 = arith.constant dense<0.000000e+00> : vector<8x128xf32>
    %27 = tpu.matmul %25, %26, %cst_20 {dimension_numbers = #tpu.dot_dimension_numbers<[1], [0], [0], [1], [0, 0, 1, 1], [], []>} : vector<8x128xbf16>, vector<128x128xbf16>, vector<8x128xf32> -> vector<8x128xf32>
    %c0_21 = arith.constant 0 : index
    %c0_22 = arith.constant 0 : index
    %28 = vector.load %arg9[%c0_21, %c0_22] : memref<1x128xf32, #tpu.memory_space<vmem>>, vector<1x128xf32>
    %29 = vector.broadcast %28 : vector<1x128xf32> to vector<8x128xf32>
    %30 = arith.addf %27, %29 : vector<8x128xf32>
    %cst_23 = arith.constant 0.000000e+00 : f32
    %31 = vector.broadcast %cst_23 : f32 to vector<8x128xf32>
    %32 = arith.maximumf %30, %31 : vector<8x128xf32>
    %33 = arith.truncf %32 : vector<8x128xf32> to vector<8x128xbf16>
    %c0_24 = arith.constant 0 : index
    %c0_25 = arith.constant 0 : index
    %34 = vector.load %arg10[%c0_24, %c0_25] : memref<128x128xbf16, #tpu.memory_space<vmem>>, vector<128x128xbf16>
    %cst_26 = arith.constant dense<0.000000e+00> : vector<8x128xf32>
    %35 = tpu.matmul %33, %34, %cst_26 {dimension_numbers = #tpu.dot_dimension_numbers<[1], [0], [0], [1], [0, 0, 1, 1], [], []>} : vector<8x128xbf16>, vector<128x128xbf16>, vector<8x128xf32> -> vector<8x128xf32>
    %c0_27 = arith.constant 0 : index
    %c0_28 = arith.constant 0 : index
    %36 = vector.load %arg11[%c0_27, %c0_28] : memref<1x128xf32, #tpu.memory_space<vmem>>, vector<1x128xf32>
    %37 = vector.broadcast %36 : vector<1x128xf32> to vector<8x128xf32>
    %38 = arith.addf %35, %37 : vector<8x128xf32>
    %c0_29 = arith.constant 0 : index
    %c0_30 = arith.constant 0 : index
    %39 = vector.load %arg12[%c0_29, %c0_30] : memref<8x128xf32, #tpu.memory_space<vmem>>, vector<8x128xf32>
    tpu.vector_store %arg12[%c0_29, %c0_30], %38 {strides = array<i32>} : memref<8x128xf32, #tpu.memory_space<vmem>>, vector<8x128xf32>,
    return
  }
  func.func @transform_0(%arg0: i32) -> (i32, i32) {
    %c0_i32 = arith.constant 0 : i32
    %c0_i32_0 = arith.constant 0 : i32
    return %arg0, %c0_i32 : i32, i32
  }
  func.func @transform_1(%arg0: i32) -> (i32, i32) {
    %c0_i32 = arith.constant 0 : i32
    %c0_i32_0 = arith.constant 0 : i32
    %c0_i32_1 = arith.constant 0 : i32
    return %c0_i32, %c0_i32_0 : i32, i32
  }
  func.func @transform_2(%arg0: i32) -> (i32, i32) {
    %c0_i32 = arith.constant 0 : i32
    %c0_i32_0 = arith.constant 0 : i32
    %c0_i32_1 = arith.constant 0 : i32
    return %c0_i32, %c0_i32_0 : i32, i32
  }
  func.func @transform_3(%arg0: i32) -> (i32, i32) {
    %c0_i32 = arith.constant 0 : i32
    %c0_i32_0 = arith.constant 0 : i32
    %c0_i32_1 = arith.constant 0 : i32
    return %c0_i32, %c0_i32_0 : i32, i32
  }
  func.func @transform_4(%arg0: i32) -> (i32, i32) {
    %c0_i32 = arith.constant 0 : i32
    %c0_i32_0 = arith.constant 0 : i32
    %c0_i32_1 = arith.constant 0 : i32
    return %c0_i32, %c0_i32_0 : i32, i32
  }
  func.func @transform_5(%arg0: i32) -> (i32, i32) {
    %c0_i32 = arith.constant 0 : i32
    %c0_i32_0 = arith.constant 0 : i32
    %c0_i32_1 = arith.constant 0 : i32
    return %c0_i32, %c0_i32_0 : i32, i32
  }
  func.func @transform_6(%arg0: i32) -> (i32, i32) {
    %c0_i32 = arith.constant 0 : i32
    %c0_i32_0 = arith.constant 0 : i32
    %c0_i32_1 = arith.constant 0 : i32
    return %c0_i32, %c0_i32_0 : i32, i32
  }
  func.func @transform_7(%arg0: i32) -> (i32, i32) {
    %c0_i32 = arith.constant 0 : i32
    %c0_i32_0 = arith.constant 0 : i32
    %c0_i32_1 = arith.constant 0 : i32
    return %c0_i32, %c0_i32_0 : i32, i32
  }
  func.func @transform_8(%arg0: i32) -> (i32, i32) {
    %c0_i32 = arith.constant 0 : i32
    %c0_i32_0 = arith.constant 0 : i32
    %c0_i32_1 = arith.constant 0 : i32
    return %c0_i32, %c0_i32_0 : i32, i32
  }
  func.func @transform_9(%arg0: i32) -> (i32, i32) {
    %c0_i32 = arith.constant 0 : i32
    %c0_i32_0 = arith.constant 0 : i32
    %c0_i32_1 = arith.constant 0 : i32
    return %c0_i32, %c0_i32_0 : i32, i32
  }
  func.func @transform_10(%arg0: i32) -> (i32, i32) {
    %c0_i32 = arith.constant 0 : i32
    %c0_i32_0 = arith.constant 0 : i32
    %c0_i32_1 = arith.constant 0 : i32
    return %c0_i32, %c0_i32_0 : i32, i32
  }
  func.func @transform_11(%arg0: i32) -> (i32, i32) {
    %c0_i32 = arith.constant 0 : i32
    %c0_i32_0 = arith.constant 0 : i32
    return %arg0, %c0_i32 : i32, i32
  }
}

</mosaic_0001>

<bundles_post_ra>
// kernel: tpu_custom_call.1
= control target key start
LH: loop header
LB: loop body
LE: loop exit
PB: predicated region body
PF: predicated region fallthrough
CT: control target
= control target key end

     0   :  { %16 = vsyncpa [#allocation3], 0  ;;  %s1609_s0 = inlined_call_operand.hbm [shape: f32[8,128], index: 0, kind: input, shape index: {}]   ;;  %s1610_s1 = inlined_call_operand.hbm [shape: bf16[128,256], index: 1, kind: input, shape index: {}]   ;;  %s1611_s2 = inlined_call_operand.vmem [shape: f32[1,256], index: 2, kind: input, shape index: {}]   ;;  %s1612_s3 = inlined_call_operand.hbm [shape: bf16[256,256], index: 3, kind: input, shape index: {}]   ;;  %s1613_s4 = inlined_call_operand.vmem [shape: f32[1,256], index: 4, kind: input, shape index: {}]   ;;  %s1614_s5 = inlined_call_operand.hbm [shape: bf16[256,128], index: 5, kind: input, shape index: {}]   ;;  %s1615_s6 = inlined_call_operand.vmem [shape: f32[1,128], index: 6, kind: input, shape index: {}]   ;;  %s1616_s7 = inlined_call_operand.hbm [shape: bf16[128,128], index: 7, kind: input, shape index: {}]   ;;  %s1617_s8 = inlined_call_operand.vmem [shape: f32[1,128], index: 8, kind: input, shape index: {}]   ;;  %s1618_s9 = inlined_call_operand.hbm [shape: bf16[128,128], index: 9, kind: input, shape index: {}]   ;;  %s1619_s10 = inlined_call_operand.vmem [shape: f32[1,128], index: 10, kind: input, shape index: {}]   ;;  %s1620_s11 = inlined_call_operand.hbm [shape: f32[8,128], index: 11, kind: output, shape index: {}]  }
   0x1   :  { %17 = vsyncpa [#allocation6], 0 }
   0x2   :  { %18 = vsyncpa [#allocation9], 0 }
   0x3   :  { %19 = vsyncpa [#allocation12], 0 }
   0x4   :  { %20 = vsyncpa [#allocation4], 0  ;;  %s1389_s17 = smov [#allocation5]   ;;  %s1225_s21 = scalar_lea.hbm %s1610_s1, 2048 }
   0x5   :  { %s36_s18 = sshll.u32 %s1389_s17, 4  ;;  %p1226_p0 = scmp.ne.s32.totalorder %s1610_s1, %s1225_s21  ;;  %s37_s18 = int_to_ptr.vmem [resolvable:$true] %s36_s18 }
   0x6   :  { %p1229_p1 = scmp.lt.u32.totalorder %s1225_s21, %s1610_s1 }
   0x8   :  { %p1231_p2 = pnand %p1229_p1, %p1226_p0 }
   0xa   :  { %1234 = shalt.err (!%p1231_p2)
}
   0xb   :  { %s1235_s26 = scalar_lea.vmem %s37_s18, 2048  ;;  %p1240_p4 = scmp.lt.s32.totalorder %s37_s18, %s37_s18 }
   0xc   :  { %p1236_p3 = scmp.ne.s32.totalorder %s37_s18, %s1235_s26  ;;  %p1241_p5 = scmp.lt.s32.totalorder %s1235_s26, %s1235_s26 }
   0xe   :  { %p1242_p6 = por %p1241_p5, %p1240_p4 }
  0x10   :  { %p1243_p7 = pnand %p1242_p6, %p1236_p3 }
  0x12   :  { %1246 = shalt.err (!%p1243_p7)
}
  0x13   :  { %s1390_s27 = smov 128   ;;  %s1391_s28 = smov 8  }
  0x14   :  { %42 = dma.hbm_to_vmem [thread:$0]  %s1610_s1, 2048, %s37_s18, [#allocation6], %s1390_s27, %s1390_s27, %s1391_s28  }
  0x15   :  { %s1392_s12 = smov [#allocation8]   ;;  %s1247_s16 = scalar_lea.hbm %s1614_s5, 2048 }
  0x16   :  { %s64_s13 = sshll.u32 %s1392_s12, 4  ;;  %p1248_p8 = scmp.ne.s32.totalorder %s1614_s5, %s1247_s16  ;;  %s65_s13 = int_to_ptr.vmem [resolvable:$true] %s64_s13 }
  0x17   :  { %p1251_p9 = scmp.lt.u32.totalorder %s1247_s16, %s1614_s5 }
  0x19   :  { %p1253_p10 = pnand %p1251_p9, %p1248_p8 }
  0x1b   :  { %1256 = shalt.err (!%p1253_p10)
}
  0x1c   :  { %s1257_s22 = scalar_lea.vmem %s65_s13, 2048  ;;  %p1262_p12 = scmp.lt.s32.totalorder %s65_s13, %s65_s13 }
  0x1d   :  { %p1258_p11 = scmp.ne.s32.totalorder %s65_s13, %s1257_s22  ;;  %p1263_p13 = scmp.lt.s32.totalorder %s1257_s22, %s1257_s22 }
  0x1f   :  { %p1264_p0 = por %p1263_p13, %p1262_p12 }
  0x21   :  { %p1265_p1 = pnand %p1264_p0, %p1258_p11 }
  0x23   :  { %1268 = shalt.err (!%p1265_p1)
}
  0x24   :  { %s1393_s1 = smov 64   ;;  %s1394_s18 = smov 4  }
  0x25   :  { %70 = dma.hbm_to_vmem [thread:$0]  %s1614_s5, 2048, %s65_s13, [#allocation9], %s1393_s1, %s1393_s1, %s1394_s18  }
  0x26   :  { %s1395_s25 = smov [#allocation2]   ;;  %s1396_s29 = smov [#allocation7]  }
  0x27   :  { %s27_s26 = sshll.u32 %s1395_s25, 4  ;;  %s50_s30 = sshll.u32 %s1396_s29, 4  ;;  %s28_s26 = int_to_ptr.vmem [resolvable:$true] %s27_s26  ;;  %s1493_s30 = int_to_ptr.vmem [resolvable:$true] %s50_s30 }
  0x28   :  { %s1269_s15 = scalar_lea.hbm %s1609_s0, 128 }
  0x29   :  { %p1270_p2 = scmp.ne.s32.totalorder %s1609_s0, %s1269_s15  ;;  %p1273_p3 = scmp.lt.u32.totalorder %s1269_s15, %s1609_s0 }
  0x2b   :  { %p1275_p4 = pnand %p1273_p3, %p1270_p2 }
  0x2d   :  { %1278 = shalt.err (!%p1275_p4)
}
  0x2e   :  { %s1279_s5 = scalar_lea.vmem %s28_s26, 128  ;;  %p1284_p6 = scmp.lt.s32.totalorder %s28_s26, %s28_s26 }
  0x2f   :  { %p1280_p5 = scmp.ne.s32.totalorder %s28_s26, %s1279_s5  ;;  %p1285_p7 = scmp.lt.s32.totalorder %s1279_s5, %s1279_s5 }
  0x31   :  { %p1286_p8 = por %p1285_p7, %p1284_p6 }
  0x33   :  { %p1287_p9 = pnand %p1286_p8, %p1280_p5 }
  0x35   :  { %1290 = shalt.err (!%p1287_p9)
}
  0x36   :  { %30 = dma.hbm_to_vmem [thread:$0]  %s1609_s0, 128, %s28_s26, [#allocation3]  }
  0x37   :  { %s1291_s24 = scalar_lea.hbm %s1612_s3, 4096 }
  0x38   :  { %p1292_p10 = scmp.ne.s32.totalorder %s1612_s3, %s1291_s24  ;;  %p1295_p11 = scmp.lt.u32.totalorder %s1291_s24, %s1612_s3 }
  0x3a   :  { %p1297_p12 = pnand %p1295_p11, %p1292_p10 }
  0x3c   :  { %1300 = shalt.err (!%p1297_p12)
}
  0x3d   :  { %s1301_s15 = scalar_lea.vmem %s1493_s30, 4096  ;;  %p1306_p0 = scmp.lt.s32.totalorder %s1493_s30, %s1493_s30 }
  0x3e   :  { %p1302_p13 = scmp.ne.s32.totalorder %s1493_s30, %s1301_s15  ;;  %p1307_p1 = scmp.lt.s32.totalorder %s1301_s15, %s1301_s15 }
  0x40   :  { %p1308_p2 = por %p1307_p1, %p1306_p0 }
  0x42   :  { %p1309_p3 = pnand %p1308_p2, %p1302_p13 }
  0x44   :  { %1312 = shalt.err (!%p1309_p3)
}
  0x45   :  { %56 = dma.hbm_to_vmem [thread:$0]  %s1612_s3, 4096, %s1493_s30, [#allocation6], %s1390_s27, %s1390_s27, %s1391_s28  }
  0x46   :  { %s1397_s16 = smov [#allocation10]   ;;  %s1398_s19 = smov [#allocation11]  }
  0x47   :  { %s78_s17 = sshll.u32 %s1397_s16, 4  ;;  %s92_s20 = sshll.u32 %s1398_s19, 4  ;;  %s79_s17 = int_to_ptr.vmem [resolvable:$true] %s78_s17  ;;  %s1527_s20 = int_to_ptr.vmem [resolvable:$true] %s92_s20 }
  0x48   :  { %s1313_s21 = scalar_lea.hbm %s1616_s7, 1024 }
  0x49   :  { %p1314_p4 = scmp.ne.s32.totalorder %s1616_s7, %s1313_s21  ;;  %p1317_p5 = scmp.lt.u32.totalorder %s1313_s21, %s1616_s7 }
  0x4b   :  { %p1319_p6 = pnand %p1317_p5, %p1314_p4 }
  0x4d   :  { %1322 = shalt.err (!%p1319_p6)
}
  0x4e   :  { %s1323_s3 = scalar_lea.vmem %s79_s17, 1024  ;;  %p1328_p8 = scmp.lt.s32.totalorder %s79_s17, %s79_s17 }
  0x4f   :  { %p1324_p7 = scmp.ne.s32.totalorder %s79_s17, %s1323_s3  ;;  %p1329_p9 = scmp.lt.s32.totalorder %s1323_s3, %s1323_s3 }
  0x51   :  { %p1330_p10 = por %p1329_p9, %p1328_p8 }
  0x53   :  { %p1331_p11 = pnand %p1330_p10, %p1324_p7 }
  0x55   :  { %1334 = shalt.err (!%p1331_p11)
}
  0x56   :  { %84 = dma.hbm_to_vmem [thread:$0]  %s1616_s7, 1024, %s79_s17, [#allocation9], %s1393_s1, %s1393_s1, %s1394_s18  }
  0x57   :  { %s1335_s12 = scalar_lea.hbm %s1618_s9, 1024 }
  0x58   :  { %p1336_p12 = scmp.ne.s32.totalorder %s1618_s9, %s1335_s12  ;;  %p1339_p13 = scmp.lt.u32.totalorder %s1335_s12, %s1618_s9 }
  0x5a   :  { %p1341_p0 = pnand %p1339_p13, %p1336_p12 }
  0x5c   :  { %1344 = shalt.err (!%p1341_p0)
}
  0x5d   :  { %s1345_s16 = scalar_lea.vmem %s1527_s20, 1024  ;;  %p1350_p2 = scmp.lt.s32.totalorder %s1527_s20, %s1527_s20 }
  0x5e   :  { %p1346_p1 = scmp.ne.s32.totalorder %s1527_s20, %s1345_s16  ;;  %p1351_p3 = scmp.lt.s32.totalorder %s1345_s16, %s1345_s16 }
  0x60   :  { %p1352_p4 = por %p1351_p3, %p1350_p2 }
  0x62   :  { %p1353_p5 = pnand %p1352_p4, %p1346_p1 }
  0x64   :  { %1356 = shalt.err (!%p1353_p5)
}
  0x65   :  { %98 = dma.hbm_to_vmem [thread:$0]  %s1618_s9, 1024, %s1527_s20, [#allocation12], %s1393_s1, %s1393_s1, %s1394_s18  }
  0x66   :  { %1379 = dma.done.wait [#allocation3], 128  }
  0x67   :  { %1380 = vsyncadd [#allocation3], 4294967168 }
  0x68   :  { %1381 = dma.done.wait [#allocation6], 6144  }
  0x69   :  { %1382 = vsyncadd [#allocation6], 4294961152 }
  0x6a   :  { %1383 = dma.done.wait [#allocation9], 3072  }
  0x6b   :  { %1384 = vsyncadd [#allocation9], 4294964224 }
  0x6c   :  { %1385 = dma.done.wait [#allocation12], 1024  }
  0x6d   :  { %1386 = vsyncadd [#allocation12], 4294966272  ;;  %v1399_v0 = vmov 0   ;;  %v1121_v1 = vld [vmem:[#allocation5 + $0x4] ss:$8 sps:$4 sm:$0xff]   ;;  %v120_v26 = vld [vmem:[#allocation2] sm:$0xff]  ;;  %v140_v63 = vlaneseq }
  0x6e   :  { %262 = vmatprep.mubr.bf16.mxu0 %v1399_v0  ;;  %v1123_v2 = vld [vmem:[#allocation5] ss:$8 sps:$4 sm:$0xff]   ;;  %230 = vmatprep.subr.bf16.mxu0 %v1121_v1  ;;  %v1124_v3 = vld [vmem:[#allocation5 + $0x14] ss:$8 sps:$4 sm:$0xff]   ;;  %v1126_v4 = vld [vmem:[#allocation5 + $0x10] ss:$8 sps:$4 sm:$0xff]   ;;  %v121_v31 = vpack.c.bf16 %v120_v26, %v120_v26 }
  0x6f   :  { %231 = vmatpush1.bf16.msra.mxu0 %v1123_v2  ;;  %v1127_v5 = vld [vmem:[#allocation5 + $0x24] ss:$8 sps:$4 sm:$0xff]   ;;  %v1129_v6 = vld [vmem:[#allocation5 + $0x20] ss:$8 sps:$4 sm:$0xff]   ;;  %v1130_v7 = vld [vmem:[#allocation5 + $0x34] ss:$8 sps:$4 sm:$0xff]  }
  0x70   :  { %232 = vmatprep.subr.bf16.mxu0 %v1124_v3  ;;  %v1132_v8 = vld [vmem:[#allocation5 + $0x30] ss:$8 sps:$4 sm:$0xff]   ;;  %v1133_v9 = vld [vmem:[#allocation5 + $0x44] ss:$8 sps:$4 sm:$0xff]   ;;  %v1147_v11 = vld [vmem:[#allocation7] ss:$8 sps:$4 sm:$0xff]  }
  0x71   :  { %v1145_v10 = vld [vmem:[#allocation7 + $0x4] ss:$8 sps:$4 sm:$0xff]   ;;  %v1148_v12 = vld [vmem:[#allocation7 + $0x14] ss:$8 sps:$4 sm:$0xff]   ;;  %v1135_v13 = vld [vmem:[#allocation5 + $0x40] ss:$8 sps:$4 sm:$0xff]  }
  0x72   :  { %479 = vmatprep.subr.bf16.mxu1 %v1145_v10  ;;  %v1150_v14 = vld [vmem:[#allocation7 + $0x10] ss:$8 sps:$4 sm:$0xff]   ;;  %v1151_v15 = vld [vmem:[#allocation7 + $0x24] ss:$8 sps:$4 sm:$0xff]   ;;  %v1136_v16 = vld [vmem:[#allocation5 + $0x54] ss:$8 sps:$4 sm:$0xff]  }
  0x73   :  { %233 = vmatpush1.bf16.msra.mxu0 %v1126_v4  ;;  %480 = vmatpush1.bf16.msra.mxu1 %v1147_v11  ;;  %v1138_v17 = vld [vmem:[#allocation5 + $0x50] ss:$8 sps:$4 sm:$0xff]   ;;  %v1153_v18 = vld [vmem:[#allocation7 + $0x20] ss:$8 sps:$4 sm:$0xff]   ;;  %v1154_v19 = vld [vmem:[#allocation7 + $0x34] ss:$8 sps:$4 sm:$0xff]  }
  0x74   :  { %234 = vmatprep.subr.bf16.mxu0 %v1127_v5  ;;  %481 = vmatprep.subr.bf16.mxu1 %v1148_v12  ;;  %v1139_v20 = vld [vmem:[#allocation5 + $0x64] ss:$8 sps:$4 sm:$0xff]   ;;  %v1141_v21 = vld [vmem:[#allocation5 + $0x60] ss:$8 sps:$4 sm:$0xff]   ;;  %v1156_v22 = vld [vmem:[#allocation7 + $0x30] ss:$8 sps:$4 sm:$0xff]  }
  0x75   :  { %v1157_v23 = vld [vmem:[#allocation7 + $0x44] ss:$8 sps:$4 sm:$0xff]   ;;  %v1142_v24 = vld [vmem:[#allocation5 + $0x74] ss:$8 sps:$4 sm:$0xff]   ;;  %v1144_v25 = vld [vmem:[#allocation5 + $0x70] ss:$8 sps:$4 sm:$0xff]  }
  0x76   :  { %v1159_v27 = vld [vmem:[#allocation7 + $0x40] ss:$8 sps:$4 sm:$0xff]   ;;  %v1160_v28 = vld [vmem:[#allocation7 + $0x54] ss:$8 sps:$4 sm:$0xff]   ;;  %v1162_v29 = vld [vmem:[#allocation7 + $0x50] ss:$8 sps:$4 sm:$0xff]  }
  0x77   :  { %235 = vmatpush1.bf16.msra.mxu0 %v1129_v6  ;;  %482 = vmatpush1.bf16.msra.mxu1 %v1150_v14  ;;  %v1163_v30 = vld [vmem:[#allocation7 + $0x64] ss:$8 sps:$4 sm:$0xff]   ;;  %v1165_v32 = vld [vmem:[#allocation7 + $0x60] ss:$8 sps:$4 sm:$0xff]   ;;  %v1166_v33 = vld [vmem:[#allocation7 + $0x74] ss:$8 sps:$4 sm:$0xff]  }
  0x78   :  { %236 = vmatprep.subr.bf16.mxu0 %v1130_v7  ;;  %483 = vmatprep.subr.bf16.mxu1 %v1151_v15  ;;  %v1168_v34 = vld [vmem:[#allocation7 + $0x70] ss:$8 sps:$4 sm:$0xff]   ;;  %v1169_v35 = vld [vmem:[#allocation7 + $0x84] ss:$8 sps:$4 sm:$0xff]   ;;  %v1171_v36 = vld [vmem:[#allocation7 + $0x80] ss:$8 sps:$4 sm:$0xff]  }
  0x79   :  { %v1172_v37 = vld [vmem:[#allocation7 + $0x94] ss:$8 sps:$4 sm:$0xff]   ;;  %v1174_v38 = vld [vmem:[#allocation7 + $0x90] ss:$8 sps:$4 sm:$0xff]   ;;  %v1175_v39 = vld [vmem:[#allocation7 + $0xa4] ss:$8 sps:$4 sm:$0xff]  }
  0x7a   :  { %v1177_v40 = vld [vmem:[#allocation7 + $0xa0] ss:$8 sps:$4 sm:$0xff]   ;;  %v1178_v41 = vld [vmem:[#allocation7 + $0xb4] ss:$8 sps:$4 sm:$0xff]   ;;  %v1180_v42 = vld [vmem:[#allocation7 + $0xb0] ss:$8 sps:$4 sm:$0xff]  }
  0x7b   :  { %237 = vmatpush1.bf16.msra.mxu0 %v1132_v8  ;;  %484 = vmatpush1.bf16.msra.mxu1 %v1153_v18  ;;  %v1181_v43 = vld [vmem:[#allocation7 + $0xc4] ss:$8 sps:$4 sm:$0xff]   ;;  %v1183_v44 = vld [vmem:[#allocation7 + $0xc0] ss:$8 sps:$4 sm:$0xff]   ;;  %v1184_v45 = vld [vmem:[#allocation7 + $0xd4] ss:$8 sps:$4 sm:$0xff]  }
  0x7c   :  { %238 = vmatprep.subr.bf16.mxu0 %v1133_v9  ;;  %485 = vmatprep.subr.bf16.mxu1 %v1154_v19  ;;  %v1186_v46 = vld [vmem:[#allocation7 + $0xd0] ss:$8 sps:$4 sm:$0xff]   ;;  %v1187_v47 = vld [vmem:[#allocation7 + $0xe4] ss:$8 sps:$4 sm:$0xff]   ;;  %v1189_v48 = vld [vmem:[#allocation7 + $0xe0] ss:$8 sps:$4 sm:$0xff]  }
  0x7d   :  { %v1190_v49 = vld [vmem:[#allocation7 + $0xf4] ss:$8 sps:$4 sm:$0xff]   ;;  %v1192_v50 = vld [vmem:[#allocation7 + $0xf0] ss:$8 sps:$4 sm:$0xff]   ;;  %v1193_v51 = vld [vmem:[#allocation8 + $0x40] sm:$0xff]   ;;  %v141_v0 = vshrl.u32 %v140_v63, 7 }
  0x7e   :  { %v1194_v52 = vld [vmem:[#allocation8] sm:$0xff]   ;;  %v1195_v53 = vld [vmem:[#allocation8 + $0x48] sm:$0xff]   ;;  %v1197_v55 = vld [vmem:[#allocation8 + $0x50] sm:$0xff]   ;;  %vm1401_vm0 = vmmov 0   ;;  %s1402_s21 = smov [#allocation13]  }
  0x7f   :  { %239 = vmatpush1.bf16.msra.mxu0 %v1135_v13  ;;  %486 = vmatpush1.bf16.msra.mxu1 %v1156_v22  ;;  %v1196_v54 = vld [vmem:[#allocation8 + $0x8] sm:$0xff]   ;;  %v1198_v56 = vld [vmem:[#allocation8 + $0x10] sm:$0xff]   ;;  %v1199_v57 = vld [vmem:[#allocation8 + $0x58] sm:$0xff]   ;;  %v142_v1 = vsub.s32 0, %v141_v0  ;;  %v146_v3 = vsub.s32 1, %v141_v0  ;;  %s932_s22 = sshll.u32 %s1402_s21, 4  ;;  %s933_s22 = int_to_ptr.vmem [resolvable:$true] %s932_s22 }
  0x80   :  { %240 = vmatprep.subr.bf16.mxu0 %v1136_v16  ;;  %487 = vmatprep.subr.bf16.mxu1 %v1157_v23  ;;  %v1200_v58 = vld [vmem:[#allocation8 + $0x18] sm:$0xff]   ;;  %v1201_v59 = vld [vmem:[#allocation8 + $0x60] sm:$0xff]   ;;  %v1203_v61 = vld [vmem:[#allocation8 + $0x68] sm:$0xff]   ;;  %p1362_p7 = scmp.lt.s32.totalorder %s933_s22, %s933_s22 }
  0x81   :  { %v1202_v60 = vld [vmem:[#allocation8 + $0x20] sm:$0xff]   ;;  %v1204_v62 = vld [vmem:[#allocation8 + $0x28] sm:$0xff]   ;;  %v138_v2 = vld [vmem:[%s1611_s2] sm:$0x3] }
  0x82   :  { %v143_v4 = vrot.slane %v138_v2, %v142_v1  ;;  %v147_v5 = vrot.slane %v138_v2, %v146_v3  ;;  %v1205_v16 = vld [vmem:[#allocation8 + $0x70] sm:$0xff]   ;;  %v1207_v18 = vld [vmem:[#allocation8 + $0x78] sm:$0xff]  }
  0x83   :  { %241 = vmatpush1.bf16.msra.mxu0 %v1138_v17  ;;  %488 = vmatpush1.bf16.msra.mxu1 %v1159_v27  ;;  %v1206_v17 = vld [vmem:[#allocation8 + $0x30] sm:$0xff]   ;;  %v1208_v19 = vld [vmem:[#allocation8 + $0x38] sm:$0xff]  }
  0x84   :  { %242 = vmatprep.subr.bf16.mxu0 %v1139_v20  ;;  %489 = vmatprep.subr.bf16.mxu1 %v1160_v28  ;;  %v1400_v20 = vmov 0.0  }
  0x87   :  { %243 = vmatpush1.bf16.msra.mxu0 %v1141_v21  ;;  %490 = vmatpush1.bf16.msra.mxu1 %v1162_v29  ;;  %v307_v21 = vld [vmem:[%s1613_s4] sm:$0x3] }
  0x88   :  { %244 = vmatprep.subr.bf16.mxu0 %v1142_v24  ;;  %491 = vmatprep.subr.bf16.mxu1 %v1163_v30  ;;  %v312_v22 = vrot.slane %v307_v21, %v142_v1  ;;  %v316_v23 = vrot.slane %v307_v21, %v146_v3  ;;  %v1018_v3 = vld [vmem:[%s1619_s10] ss:$0 sm:$0xff] }
  0x8b   :  { %245 = vmatpush1.bf16.msra.mxu0 %v1144_v25  ;;  %492 = vmatpush1.bf16.msra.mxu1 %v1165_v32 }
  0x8c   :  { %493 = vmatprep.subr.bf16.mxu1 %v1166_v33  ;;  %1027 = vmatprep.subr.bf16.mxu0 %v1193_v51  ;;  %v1209_v33 = vld [vmem:[#allocation10] sm:$0xff]  }
  0x8e   :  { %263 = vmatmul.mubr.bf16.vlgmr.msra.gmra.mrb[0].mxu0 %v121_v31 }
  0x8f   :  { %494 = vmatpush1.bf16.msra.mxu1 %v1168_v34  ;;  %1028 = vmatpush3.bf16.msra.mxu0 %v1194_v52 }
  0x90   :  { %495 = vmatprep.subr.bf16.mxu1 %v1169_v35  ;;  %1029 = vmatprep.subr.bf16.mxu0 %v1195_v53  ;;  %v1210_v35 = vld [vmem:[#allocation10 + $0x8] sm:$0xff]  }
  0x93   :  { %496 = vmatpush1.bf16.msra.mxu1 %v1171_v36  ;;  %1030 = vmatpush3.bf16.msra.mxu0 %v1196_v54  ;;  %v1211_v36 = vld [vmem:[#allocation10 + $0x10] sm:$0xff]  }
  0x94   :  { %497 = vmatprep.subr.bf16.mxu1 %v1172_v37  ;;  %1031 = vmatprep.subr.bf16.mxu0 %v1197_v55  ;;  %v1212_v37 = vld [vmem:[#allocation10 + $0x18] sm:$0xff]  }
  0x97   :  { %498 = vmatpush1.bf16.msra.mxu1 %v1174_v38  ;;  %1032 = vmatpush3.bf16.msra.mxu0 %v1198_v56  ;;  %v1213_v38 = vld [vmem:[#allocation10 + $0x20] sm:$0xff]  }
  0x98   :  { %499 = vmatprep.subr.bf16.mxu1 %v1175_v39  ;;  %1033 = vmatprep.subr.bf16.mxu0 %v1199_v57  ;;  %v1214_v39 = vld [vmem:[#allocation10 + $0x28] sm:$0xff]   ;;  %v1223_v57 = vld [vmem:[#allocation11 + $0x30] sm:$0xff]  }
  0x9b   :  { %500 = vmatpush1.bf16.msra.mxu1 %v1177_v40  ;;  %1034 = vmatpush3.bf16.msra.mxu0 %v1200_v58  ;;  %v1215_v40 = vld [vmem:[#allocation10 + $0x30] sm:$0xff]   ;;  %v1224_v58 = vld [vmem:[#allocation11 + $0x38] sm:$0xff]  }
  0x9c   :  { %501 = vmatprep.subr.bf16.mxu1 %v1178_v41  ;;  %1035 = vmatprep.subr.bf16.mxu0 %v1201_v59  ;;  %v1216_v41 = vld [vmem:[#allocation10 + $0x38] sm:$0xff]  }
  0x9d   :  { %v1009_v59 = vld [vmem:[%s1617_s8] ss:$0 sm:$0xff]  ;;  %s1357_s8 = scalar_lea.vmem %s933_s22, 128 }
  0x9e   :  { %p1358_p6 = scmp.ne.s32.totalorder %s933_s22, %s1357_s8  ;;  %p1363_p8 = scmp.lt.s32.totalorder %s1357_s8, %s1357_s8 }
  0x9f   :  { %502 = vmatpush1.bf16.msra.mxu1 %v1180_v42  ;;  %1036 = vmatpush3.bf16.msra.mxu0 %v1202_v60  ;;  %v1217_v42 = vld [vmem:[#allocation11] sm:$0xff]  }
  0xa0   :  { %503 = vmatprep.subr.bf16.mxu1 %v1181_v43  ;;  %1037 = vmatprep.subr.bf16.mxu0 %v1203_v61  ;;  %v1218_v43 = vld [vmem:[#allocation11 + $0x8] sm:$0xff]   ;;  %p1364_p9 = por %p1363_p8, %p1362_p7 }
  0xa2   :  { %p1365_p10 = pnand %p1364_p9, %p1358_p6 }
  0xa3   :  { %504 = vmatpush1.bf16.msra.mxu1 %v1183_v44  ;;  %1038 = vmatpush3.bf16.msra.mxu0 %v1204_v62  ;;  %v1219_v44 = vld [vmem:[#allocation11 + $0x10] sm:$0xff]  }
  0xa4   :  { %505 = vmatprep.subr.bf16.mxu1 %v1184_v45  ;;  %1039 = vmatprep.subr.bf16.mxu0 %v1205_v16  ;;  %v1220_v45 = vld [vmem:[#allocation11 + $0x18] sm:$0xff]  }
  0xa7   :  { %506 = vmatpush1.bf16.msra.mxu1 %v1186_v46  ;;  %1040 = vmatpush3.bf16.msra.mxu0 %v1206_v17  ;;  %v1221_v46 = vld [vmem:[#allocation11 + $0x20] sm:$0xff]  }
  0xa8   :  { %507 = vmatprep.subr.bf16.mxu1 %v1187_v47  ;;  %1041 = vmatprep.subr.bf16.mxu0 %v1207_v18  ;;  %v1222_v47 = vld [vmem:[#allocation11 + $0x28] sm:$0xff]  }
  0xab   :  { %508 = vmatpush1.bf16.msra.mxu1 %v1189_v48  ;;  %1042 = vmatpush3.bf16.msra.mxu0 %v1208_v19 }
  0xac   :  { %509 = vmatprep.subr.bf16.mxu1 %v1190_v49  ;;  %1067 = vmatprep.subr.bf16.mxu0 %v1400_v20  ;;  %v992_v49 = vld [vmem:[%s1615_s6] ss:$0 sm:$0xff] }
  0xaf   :  { %510 = vmatpush1.bf16.msra.mxu1 %v1192_v50 }
  0xb0   :  { %1087 = vmatprep.subr.bf16.mxu1 %v1400_v20 }
 0x161   :  { %v264_v6 = vpop.f32.mrb[0].mxu0 }
 0x162   :  { %v265_v7 = vadd.f32 %v264_v6, %v143_v4  ;;  %v266_v8 = vpop.f32.mrb[1].mxu0 }
 0x163   :  { %v267_v9 = vadd.f32 %v266_v8, %v147_v5  ;;  %v268_v10 = vpop.f32.mrb[2].mxu0 }
 0x164   :  { %v271_v11 = vmax.f32 %v265_v7, 0.0  ;;  %v269_v12 = vpop.f32.mrb[3].mxu0 }
 0x165   :  { %v272_v13 = vmax.f32 %v267_v9, 0.0 }
 0x166   :  { %v273_v15 = vpack.c.bf16 %v271_v11, %v271_v11 }
 0x167   :  { %v274_v14 = vpack.c.bf16 %v272_v13, %v272_v13 }
 0x169   :  { %511 = vmatprep.mubr.bf16.mxu1 %v274_v14 }
 0x16a   :  { %512 = vmatmul.mubr.bf16.vlgmr.msra.gmra.mrb[0].mxu1 %v273_v15 }
 0x16b   :  { %1103 = vmatprep.mubr.msk.bf16.mxu1 %vm1401_vm0, %v1400_v20  ;;  %1088 = vmatpush3.bf16.msra.mxu1 %v1217_v42 }
 0x16c   :  { %1089 = vmatprep.subr.bf16.mxu1 %v1400_v20 }
 0x16f   :  { %1090 = vmatpush3.bf16.msra.mxu1 %v1218_v43 }
 0x170   :  { %1091 = vmatprep.subr.bf16.mxu1 %v1400_v20 }
 0x173   :  { %1092 = vmatpush3.bf16.msra.mxu1 %v1219_v44 }
 0x174   :  { %1093 = vmatprep.subr.bf16.mxu1 %v1400_v20 }
 0x177   :  { %1094 = vmatpush3.bf16.msra.mxu1 %v1220_v45 }
 0x178   :  { %1095 = vmatprep.subr.bf16.mxu1 %v1400_v20 }
 0x17b   :  { %1096 = vmatpush3.bf16.msra.mxu1 %v1221_v46 }
 0x17c   :  { %1097 = vmatprep.subr.bf16.mxu1 %v1400_v20 }
 0x17f   :  { %1098 = vmatpush3.bf16.msra.mxu1 %v1222_v47 }
 0x180   :  { %1099 = vmatprep.subr.bf16.mxu1 %v1400_v20 }
 0x183   :  { %1100 = vmatpush3.bf16.msra.mxu1 %v1223_v57 }
 0x184   :  { %1101 = vmatprep.subr.bf16.mxu1 %v1400_v20 }
 0x187   :  { %1102 = vmatpush3.bf16.msra.mxu1 %v1224_v58 }
 0x23d   :  { %v513_v24 = vpop.f32.mrb[0].mxu1 }
 0x23e   :  { %v514_v25 = vadd.f32 %v513_v24, %v312_v22  ;;  %v515_v26 = vpop.f32.mrb[1].mxu1 }
 0x23f   :  { %v516_v27 = vadd.f32 %v515_v26, %v316_v23  ;;  %v517_v28 = vpop.f32.mrb[2].mxu1 }
 0x240   :  { %v520_v29 = vmax.f32 %v514_v25, 0.0  ;;  %v518_v30 = vpop.f32.mrb[3].mxu1 }
 0x241   :  { %v521_v31 = vmax.f32 %v516_v27, 0.0 }
 0x242   :  { %v522_v34 = vpack.c.bf16 %v520_v29, %v520_v29 }
 0x243   :  { %v523_v32 = vpack.c.bf16 %v521_v31, %v521_v31 }
 0x245   :  { %691 = vmatprep.mubr.bf16.mxu0 %v523_v32 }
 0x246   :  { %692 = vmatmul.mubr.bf16.vlgmr.msra.gmra.mrb[4].mxu0 %v522_v34 }
 0x247   :  { %1068 = vmatpush3.bf16.msra.mxu0 %v1209_v33  ;;  %1083 = vmatprep.mubr.msk.bf16.mxu0 %vm1401_vm0, %v1400_v20 }
 0x248   :  { %1069 = vmatprep.subr.bf16.mxu0 %v1400_v20 }
 0x24b   :  { %1070 = vmatpush3.bf16.msra.mxu0 %v1210_v35 }
 0x24c   :  { %1071 = vmatprep.subr.bf16.mxu0 %v1400_v20 }
 0x24f   :  { %1072 = vmatpush3.bf16.msra.mxu0 %v1211_v36 }
 0x250   :  { %1073 = vmatprep.subr.bf16.mxu0 %v1400_v20 }
 0x253   :  { %1074 = vmatpush3.bf16.msra.mxu0 %v1212_v37 }
 0x254   :  { %1075 = vmatprep.subr.bf16.mxu0 %v1400_v20 }
 0x257   :  { %1076 = vmatpush3.bf16.msra.mxu0 %v1213_v38 }
 0x258   :  { %1077 = vmatprep.subr.bf16.mxu0 %v1400_v20 }
 0x25b   :  { %1078 = vmatpush3.bf16.msra.mxu0 %v1214_v39 }
 0x25c   :  { %1079 = vmatprep.subr.bf16.mxu0 %v1400_v20 }
 0x25f   :  { %1080 = vmatpush3.bf16.msra.mxu0 %v1215_v40 }
 0x260   :  { %1081 = vmatprep.subr.bf16.mxu0 %v1400_v20 }
 0x263   :  { %1082 = vmatpush3.bf16.msra.mxu0 %v1216_v41 }
 0x319   :  { %v1043_v48 = vpop.f32.mrb[4].mxu0 }
 0x31a   :  { %v1044_v50 = vpop.f32.mrb[5].mxu0 }
 0x31b   :  { %v1045_v51 = vadd.f32 %v1044_v50, %v1043_v48  ;;  %v1046_v52 = vpop.f32.mrb[6].mxu0 }
 0x31c   :  { %v1047_v53 = vpop.f32.mrb[7].mxu0 }
 0x31d   :  { %v694_v54 = vadd.f32 %v1045_v51, %v992_v49 }
 0x31f   :  { %v699_v55 = vmax.f32 %v694_v54, 0.0 }
 0x321   :  { %v700_v56 = vpack.c.bf16 %v699_v55, %v699_v55 }
 0x323   :  { %1084 = vmatmul.mubr.bf16.vlgmr.msra.gmra.mrb[8].mxu0 %v700_v56 }
 0x3f6   :  { %v806_v60 = vpop.f32.mrb[8].mxu0 }
 0x3f7   :  { %v807_v61 = vadd.f32 %v1009_v59, %v806_v60  ;;  %v1085_v62 = vpop.f32.mrb[9].mxu0 }
 0x3f8   :  { %v809_v63 = vpop.f32.mrb[10].mxu0 }
 0x3f9   :  { %v812_v0 = vmax.f32 %v807_v61, 0.0  ;;  %v1086_v1 = vpop.f32.mrb[11].mxu0 }
 0x3fb   :  { %v813_v2 = vpack.c.bf16 %v812_v0, %v812_v0 }
 0x3fd   :  { %1104 = vmatmul.mubr.bf16.vlgmr.msra.gmra.mrb[4].mxu1 %v813_v2 }
 0x4d0   :  { %v919_v4 = vpop.f32.mrb[4].mxu1 }
 0x4d1   :  { %v920_v5 = vadd.f32 %v1018_v3, %v919_v4  ;;  %v1105_v6 = vpop.f32.mrb[5].mxu1 }
 0x4d2   :  { %v922_v7 = vpop.f32.mrb[6].mxu1 }
 0x4d3   :  { %925 = vst [vmem:[#allocation13] sm:$0xff] %v920_v5  ;;  %v1106_v8 = vpop.f32.mrb[7].mxu1 }
 0x4d4   :  { %1368 = shalt.err (!%p1365_p10)
}
 0x4d5   :  { %s1369_s10 = scalar_lea.hbm %s1620_s11, 128 }
 0x4d6   :  { %p1370_p11 = scmp.ne.s32.totalorder %s1620_s11, %s1369_s10  ;;  %p1373_p12 = scmp.lt.u32.totalorder %s1369_s10, %s1620_s11 }
 0x4d8   :  { %p1375_p13 = pnand %p1373_p12, %p1370_p11 }
 0x4da   :  { %1378 = shalt.err (!%p1375_p13)
}
 0x4db   :  { %935 = dma.vmem_to_hbm [thread:$0]  %s933_s22, 128, %s1620_s11, [#allocation4]  }
 0x4dc   :  { %1387 = dma.done.wait [#allocation4], 128  }
 0x4dd   :  { %1388 = vsyncadd [#allocation4], 4294967168 }
 0x4de   :  { %939 = vsyncpa [#allocation3], 1 }
 0x4df   :  { %940 = vsyncpa [#allocation6], 1 }
 0x4e0   :  { %941 = vsyncpa [#allocation9], 1 }
 0x4e1   :  { %942 = vsyncpa [#allocation12], 1 }
 0x4e2   :  { %943 = vsyncpa [#allocation4], 1 }

</bundles_post_ra>
